<compile_context>
chip_gen: v6e
topology: v6e:2x2x1
jax: 0.10.0
libtpu: 0.0.40
codegen_flags: <defaults>
</compile_context>

<pallas_src>
import functools

import jax
import jax.numpy as jnp
from jax.experimental import pallas as pl
from jax.experimental.pallas import tpu as pltpu


HIDDEN_SIZES = (256, 128, 64, 32)
BN_EPS = 1e-5
_LANE = 128
_TB_MAX = 2048


def _round_up(x, m):
    return (x + m - 1) // m * m


def _col_layout(hidden_sizes, output_size):
    """(offset, padded_size) per layer inside the concatenated bias row."""
    sizes = [_round_up(h, _LANE) for h in hidden_sizes] + [_round_up(output_size, _LANE)]
    layout, off = [], 0
    for s in sizes:
        layout.append((off, s))
        off += s
    return tuple(layout), off


def _choose_tile(batch):
    """Batch tile (multiple of 128) minimizing padding; >=2 tiles when possible
    so the parallel grid axis can shard across v7x's two TensorCores."""
    num_tiles = max(1, -(-batch // _TB_MAX))
    if batch >= 2 * _LANE:
        num_tiles = max(num_tiles, 2)
    tb = _round_up(-(-batch // num_tiles), _LANE)
    num_tiles = -(-batch // tb)
    return tb, num_tiles


def _dnn_news_kernel(x_ref, *refs, bias_layout):
    """Fused forward pass for one batch tile.

    refs = (w1..wL, wout, bias_ref, o_ref).  Hidden layer i (BN folded):
        h = relu_f32(h_bf16 @ W'_i + b'_i).astype(bf16)
    The final layer's single real column is repacked into a lane-dense
    (tb//128, 128) slab (one vxpose per 128-row block).
    """
    o_ref = refs[-1]
    b_ref = refs[-2]
    w_refs = refs[:-2]

    h = x_ref[...]  # bf16 (tb, feat)

    # Hidden layers.
    for li, (off, size) in enumerate(bias_layout[:-1]):
        z = jnp.dot(h, w_refs[li][...], preferred_element_type=jnp.float32)
        z = z + b_ref[:, off:off + size]
        h = jnp.maximum(z, 0.0).astype(jnp.bfloat16)

    # Output layer (only column 0 is real; padded columns are exact zeros).
    off, size = bias_layout[-1]
    z = jnp.dot(h, w_refs[-1][...], preferred_element_type=jnp.float32)
    z = z + b_ref[:, off:off + size]  # (tb, 128) f32

    # Repack column 0 into a lane-dense (tb//128, 128) slab: per 128-row block,
    # one 128x128 transpose (XLU) then take row 0.
    tb = z.shape[0]
    rows = []
    for r in range(tb // _LANE):
        blk = z[r * _LANE:(r + 1) * _LANE, :]          # (128, 128) f32
        rows.append(jnp.transpose(blk)[0:1, :])        # (1, 128)
    packed = jnp.concatenate(rows, axis=0) if len(rows) > 1 else rows[0]
    o_ref[...] = packed[None].astype(o_ref.dtype)      # (1, tb//128, 128)


def init_params(key, input_size, hidden_sizes=HIDDEN_SIZES, output_size=1):
    """PyTorch-like raw parameters: Linear (uniform fan-in) + BatchNorm1d
    defaults (gamma=1, beta=0, running_mean=0, running_var=1)."""
    sizes = [input_size] + list(hidden_sizes) + [output_size]
    params = {}
    for i in range(len(sizes) - 1):
        fan_in, fan_out = sizes[i], sizes[i + 1]
        key, kw, kb = jax.random.split(key, 3)
        bound = 1.0 / float(fan_in) ** 0.5
        # Stored as [in, out] so the kernel does x @ W.
        params[f"w{i + 1}"] = jax.random.uniform(
            kw, (fan_in, fan_out), jnp.float32, -bound, bound)
        params[f"b{i + 1}"] = jax.random.uniform(
            kb, (1, fan_out), jnp.float32, -bound, bound)
    for i, h in enumerate(hidden_sizes):
        params[f"gamma{i + 1}"] = jnp.ones((1, h), jnp.float32)
        params[f"beta{i + 1}"] = jnp.zeros((1, h), jnp.float32)
        params[f"mean{i + 1}"] = jnp.zeros((1, h), jnp.float32)
        params[f"var{i + 1}"] = jnp.ones((1, h), jnp.float32)
    return params


def fold_params(params, hidden_sizes=HIDDEN_SIZES, output_size=1):
    """Host-side folding: BN(eval) absorbed into W/b, every sub-128 dim
    zero-padded to 128 (padded biases are exactly 0), weights cast to bf16,
    biases concatenated into a single lane-aligned f32 row."""
    layout, _ = _col_layout(hidden_sizes, output_size)
    n_hidden = len(hidden_sizes)
    folded, biases = {}, []

    for i in range(1, n_hidden + 1):
        scale = params[f"gamma{i}"] / jnp.sqrt(params[f"var{i}"] + BN_EPS)
        shift = params[f"beta{i}"] - params[f"mean{i}"] * scale
        w = params[f"w{i}"] * scale
        b = params[f"b{i}"] * scale + shift
        in_real, out_real = w.shape
        in_pad = in_real if i == 1 else _round_up(in_real, _LANE)
        out_pad = layout[i - 1][1]
        folded[f"w{i}"] = jnp.pad(
            w, ((0, in_pad - in_real), (0, out_pad - out_real))).astype(jnp.bfloat16)
        biases.append(jnp.pad(b, ((0, 0), (0, out_pad - out_real))))

    i = n_hidden + 1
    w, b = params[f"w{i}"], params[f"b{i}"]
    in_real, out_real = w.shape
    in_pad, out_pad = _round_up(in_real, _LANE), layout[-1][1]
    folded[f"w{i}"] = jnp.pad(
        w, ((0, in_pad - in_real), (0, out_pad - out_real))).astype(jnp.bfloat16)
    biases.append(jnp.pad(b, ((0, 0), (0, out_pad - out_real))))

    folded["bias"] = jnp.concatenate(biases, axis=1).astype(jnp.float32)
    return folded


@functools.partial(jax.jit, static_argnames=("hidden_sizes", "output_size"))
def dnn_news_forward(x, folded, hidden_sizes=HIDDEN_SIZES, output_size=1):
    assert output_size == 1, "packed-output path supports output_size == 1"
    batch, feat = x.shape
    n_layers = len(hidden_sizes) + 1
    bias_layout, _ = _col_layout(hidden_sizes, output_size)

    tb, num_tiles = _choose_tile(batch)
    batch_pad = tb * num_tiles
    rows_per_tile = tb // _LANE

    x = x.astype(jnp.bfloat16)
    if batch_pad != batch:
        x = jnp.pad(x, ((0, batch_pad - batch), (0, 0)))

    weights = [folded[f"w{i}"] for i in range(1, n_layers + 1)]
    bias = folded["bias"]

    # x / out tiled over batch; weights + bias full-block with constant
    # index_maps so they stay VMEM-resident across grid steps.
    x_spec = pl.BlockSpec((tb, feat), lambda i: (i, 0))
    w_specs = [pl.BlockSpec(w.shape, lambda i: (0, 0)) for w in weights]
    b_spec = pl.BlockSpec(bias.shape, lambda i: (0, 0))
    out_spec = pl.BlockSpec((1, rows_per_tile, _LANE), lambda i: (i, 0, 0))

    flops = 2 * batch_pad * sum(int(w.shape[0]) * int(w.shape[1]) for w in weights)
    bytes_accessed = (
        x.size * x.dtype.itemsize
        + sum(w.size * w.dtype.itemsize for w in weights)
        + bias.size * bias.dtype.itemsize
        + batch_pad * 4
    )

    kernel = functools.partial(_dnn_news_kernel, bias_layout=bias_layout)

    out = pl.pallas_call(
        kernel,
        out_shape=jax.ShapeDtypeStruct((num_tiles, rows_per_tile, _LANE), jnp.float32),
        grid=(num_tiles,),
        in_specs=[x_spec] + w_specs + [b_spec],
        out_specs=out_spec,
        compiler_params=pltpu.CompilerParams(
            dimension_semantics=("parallel",)),
        cost_estimate=pl.CostEstimate(
            flops=flops, transcendentals=0, bytes_accessed=bytes_accessed),
    )(x, *weights, bias)

    return out.reshape(-1)[:batch].reshape(batch, output_size)


def reference_forward_bf16(x, folded, hidden_sizes=HIDDEN_SIZES, output_size=1):
    """Pure-JAX reference mirroring the kernel's bf16-matmul / f32-epilogue
    arithmetic on the folded, padded parameters (tight comparison)."""
    layout, _ = _col_layout(hidden_sizes, output_size)
    bias = folded["bias"]
    n = len(hidden_sizes)
    h = x.astype(jnp.bfloat16)
    for i in range(1, n + 1):
        off, size = layout[i - 1]
        z = jnp.dot(h, folded[f"w{i}"], preferred_element_type=jnp.float32)
        z = z + bias[:, off:off + size]
        h = jnp.maximum(z, 0.0).astype(jnp.bfloat16)
    off, size = layout[-1]
    z = jnp.dot(h, folded[f"w{n + 1}"], preferred_element_type=jnp.float32)
    z = z + bias[:, off:off + size]
    return z[:, :output_size]


def reference_forward_f32(x, params, hidden_sizes=HIDDEN_SIZES):
    """Full-precision, unfused eval-mode reference (loose comparison)."""
    h = x
    for i in range(1, len(hidden_sizes) + 1):
        h = h @ params[f"w{i}"] + params[f"b{i}"]
        scale = params[f"gamma{i}"] / jnp.sqrt(params[f"var{i}"] + BN_EPS)
        shift = params[f"beta{i}"] - params[f"mean{i}"] * scale
        h = jnp.maximum(h * scale + shift, 0.0)
    n = len(hidden_sizes) + 1
    return h @ params[f"w{n}"] + params[f"b{n}"]


if __name__ == "__main__":
    key = jax.random.PRNGKey(0)
    key_x, key_x2, key_p = jax.random.split(key, 3)

    input_size = 32
    params = init_params(key_p, input_size)
    folded = fold_params(params)

    # Small single-tile case.
    batch = 8
    x = jax.random.normal(key_x, (batch, input_size), jnp.float32)
    out = dnn_news_forward(x, folded)
    jax.block_until_ready(out)
    assert out.shape == (batch, 1), out.shape
    ref_bf16 = reference_forward_bf16(x, folded)
    assert jnp.allclose(out, ref_bf16, atol=2e-3, rtol=2e-3), \
        "mismatch vs bf16-matched reference (small batch)"
    ref_f32 = reference_forward_f32(x, params)
    assert jnp.allclose(out, ref_f32, atol=5e-2, rtol=5e-2), \
        "mismatch vs f32 reference (small batch)"

    # Multi-tile case (exercises batch padding, the 2-step parallel grid and
    # the multi-row packed output).
    batch2 = 300
    x2 = jax.random.normal(key_x2, (batch2, input_size), jnp.float32)
    out2 = dnn_news_forward(x2, folded)
    jax.block_until_ready(out2)
    assert out2.shape == (batch2, 1), out2.shape
    ref2_bf16 = reference_forward_bf16(x2, folded)
    assert jnp.allclose(out2, ref2_bf16, atol=2e-3, rtol=2e-3), \
        "mismatch vs bf16-matched reference (multi-tile batch)"
    ref2_f32 = reference_forward_f32(x2, params)
    assert jnp.allclose(out2, ref2_f32, atol=5e-2, rtol=5e-2), \
        "mismatch vs f32 reference (multi-tile batch)"

    print("KERNEL_OK")
</pallas_src>

<mosaic_0001>
module attributes {stable_mosaic.version = 11 : i64} {
  func.func @_dnn_news_kernel(%arg0: i32, %arg1: memref<128x32xbf16, #tpu.memory_space<vmem>>, %arg2: memref<32x256xbf16, #tpu.memory_space<vmem>>, %arg3: memref<256x128xbf16, #tpu.memory_space<vmem>>, %arg4: memref<128x128xbf16, #tpu.memory_space<vmem>>, %arg5: memref<128x128xbf16, #tpu.memory_space<vmem>>, %arg6: memref<128x128xbf16, #tpu.memory_space<vmem>>, %arg7: memref<1x768xf32, #tpu.memory_space<vmem>>, %arg8: memref<1x1x128xf32, #tpu.memory_space<vmem>>) attributes {dimension_semantics = [#tpu.dimension_semantics<parallel>], iteration_bounds = array<i64: 1>, scalar_prefetch = 0 : i64, scratch_operands = 0 : i64, tpu.core_type = #tpu.core_type<tc>, window_params = [{transform_indices = @transform_0, window_bounds = array<i64: 128, 32>}, {pipeline_mode = #tpu.pipeline_mode<synchronous>, transform_indices = @transform_1, window_bounds = array<i64: 32, 256>}, {pipeline_mode = #tpu.pipeline_mode<synchronous>, transform_indices = @transform_2, window_bounds = array<i64: 256, 128>}, {pipeline_mode = #tpu.pipeline_mode<synchronous>, transform_indices = @transform_3, window_bounds = array<i64: 128, 128>}, {pipeline_mode = #tpu.pipeline_mode<synchronous>, transform_indices = @transform_4, window_bounds = array<i64: 128, 128>}, {pipeline_mode = #tpu.pipeline_mode<synchronous>, transform_indices = @transform_5, window_bounds = array<i64: 128, 128>}, {pipeline_mode = #tpu.pipeline_mode<synchronous>, transform_indices = @transform_6, window_bounds = array<i64: 1, 768>}, {transform_indices = @transform_7, window_bounds = array<i64: 1, 1, 128>}]} {
    %c0 = arith.constant 0 : index
    %c0_0 = arith.constant 0 : index
    %0 = vector.load %arg1[%c0, %c0_0] : memref<128x32xbf16, #tpu.memory_space<vmem>>, vector<128x32xbf16>
    %c0_1 = arith.constant 0 : index
    %c0_2 = arith.constant 0 : index
    %1 = vector.load %arg2[%c0_1, %c0_2] : memref<32x256xbf16, #tpu.memory_space<vmem>>, vector<32x256xbf16>
    %cst = arith.constant dense<0.000000e+00> : vector<128x256xf32>
    %2 = tpu.matmul %0, %1, %cst {dimension_numbers = #tpu.dot_dimension_numbers<[1], [0], [0], [1], [0, 0, 1, 1], [], []>} : vector<128x32xbf16>, vector<32x256xbf16>, vector<128x256xf32> -> vector<128x256xf32>
    %c0_3 = arith.constant 0 : index
    %c0_4 = arith.constant 0 : index
    %3 = vector.load %arg7[%c0_3, %c0_4] : memref<1x768xf32, #tpu.memory_space<vmem>>, vector<1x256xf32>
    %4 = vector.broadcast %3 : vector<1x256xf32> to vector<128x256xf32>
    %5 = arith.addf %2, %4 : vector<128x256xf32>
    %cst_5 = arith.constant 0.000000e+00 : f32
    %6 = vector.broadcast %cst_5 : f32 to vector<128x256xf32>
    %7 = arith.maximumf %5, %6 : vector<128x256xf32>
    %8 = arith.truncf %7 : vector<128x256xf32> to vector<128x256xbf16>
    %c0_6 = arith.constant 0 : index
    %c0_7 = arith.constant 0 : index
    %9 = vector.load %arg3[%c0_6, %c0_7] : memref<256x128xbf16, #tpu.memory_space<vmem>>, vector<256x128xbf16>
    %cst_8 = arith.constant dense<0.000000e+00> : vector<128x128xf32>
    %10 = tpu.matmul %8, %9, %cst_8 {dimension_numbers = #tpu.dot_dimension_numbers<[1], [0], [0], [1], [0, 0, 1, 1], [], []>} : vector<128x256xbf16>, vector<256x128xbf16>, vector<128x128xf32> -> vector<128x128xf32>
    %c0_9 = arith.constant 0 : index
    %c256 = arith.constant 256 : index
    %11 = vector.load %arg7[%c0_9, %c256] : memref<1x768xf32, #tpu.memory_space<vmem>>, vector<1x128xf32>
    %12 = vector.broadcast %11 : vector<1x128xf32> to vector<128x128xf32>
    %13 = arith.addf %10, %12 : vector<128x128xf32>
    %cst_10 = arith.constant 0.000000e+00 : f32
    %14 = vector.broadcast %cst_10 : f32 to vector<128x128xf32>
    %15 = arith.maximumf %13, %14 : vector<128x128xf32>
    %16 = arith.truncf %15 : vector<128x128xf32> to vector<128x128xbf16>
    %c0_11 = arith.constant 0 : index
    %c0_12 = arith.constant 0 : index
    %17 = vector.load %arg4[%c0_11, %c0_12] : memref<128x128xbf16, #tpu.memory_space<vmem>>, vector<128x128xbf16>
    %cst_13 = arith.constant dense<0.000000e+00> : vector<128x128xf32>
    %18 = tpu.matmul %16, %17, %cst_13 {dimension_numbers = #tpu.dot_dimension_numbers<[1], [0], [0], [1], [0, 0, 1, 1], [], []>} : vector<128x128xbf16>, vector<128x128xbf16>, vector<128x128xf32> -> vector<128x128xf32>
    %c0_14 = arith.constant 0 : index
    %c384 = arith.constant 384 : index
    %19 = vector.load %arg7[%c0_14, %c384] : memref<1x768xf32, #tpu.memory_space<vmem>>, vector<1x128xf32>
    %20 = vector.broadcast %19 : vector<1x128xf32> to vector<128x128xf32>
    %21 = arith.addf %18, %20 : vector<128x128xf32>
    %cst_15 = arith.constant 0.000000e+00 : f32
    %22 = vector.broadcast %cst_15 : f32 to vector<128x128xf32>
    %23 = arith.maximumf %21, %22 : vector<128x128xf32>
    %24 = arith.truncf %23 : vector<128x128xf32> to vector<128x128xbf16>
    %c0_16 = arith.constant 0 : index
    %c0_17 = arith.constant 0 : index
    %25 = vector.load %arg5[%c0_16, %c0_17] : memref<128x128xbf16, #tpu.memory_space<vmem>>, vector<128x128xbf16>
    %cst_18 = arith.constant dense<0.000000e+00> : vector<128x128xf32>
    %26 = tpu.matmul %24, %25, %cst_18 {dimension_numbers = #tpu.dot_dimension_numbers<[1], [0], [0], [1], [0, 0, 1, 1], [], []>} : vector<128x128xbf16>, vector<128x128xbf16>, vector<128x128xf32> -> vector<128x128xf32>
    %c0_19 = arith.constant 0 : index
    %c512 = arith.constant 512 : index
    %27 = vector.load %arg7[%c0_19, %c512] : memref<1x768xf32, #tpu.memory_space<vmem>>, vector<1x128xf32>
    %28 = vector.broadcast %27 : vector<1x128xf32> to vector<128x128xf32>
    %29 = arith.addf %26, %28 : vector<128x128xf32>
    %cst_20 = arith.constant 0.000000e+00 : f32
    %30 = vector.broadcast %cst_20 : f32 to vector<128x128xf32>
    %31 = arith.maximumf %29, %30 : vector<128x128xf32>
    %32 = arith.truncf %31 : vector<128x128xf32> to vector<128x128xbf16>
    %c0_21 = arith.constant 0 : index
    %c0_22 = arith.constant 0 : index
    %33 = vector.load %arg6[%c0_21, %c0_22] : memref<128x128xbf16, #tpu.memory_space<vmem>>, vector<128x128xbf16>
    %cst_23 = arith.constant dense<0.000000e+00> : vector<128x128xf32>
    %34 = tpu.matmul %32, %33, %cst_23 {dimension_numbers = #tpu.dot_dimension_numbers<[1], [0], [0], [1], [0, 0, 1, 1], [], []>} : vector<128x128xbf16>, vector<128x128xbf16>, vector<128x128xf32> -> vector<128x128xf32>
    %c0_24 = arith.constant 0 : index
    %c640 = arith.constant 640 : index
    %35 = vector.load %arg7[%c0_24, %c640] : memref<1x768xf32, #tpu.memory_space<vmem>>, vector<1x128xf32>
    %36 = vector.broadcast %35 : vector<1x128xf32> to vector<128x128xf32>
    %37 = arith.addf %34, %36 : vector<128x128xf32>
    %38 = tpu.transpose %37, [1, 0] : vector<128x128xf32> -> vector<128x128xf32>
    %39 = vector.extract_strided_slice %38 {offsets = [0, 0], sizes = [1, 128], strides = [1, 1]} : vector<128x128xf32> to vector<1x128xf32>
    %40 = vector.shape_cast %39 : vector<1x128xf32> to vector<1x1x128xf32>
    %c0_25 = arith.constant 0 : index
    %c0_26 = arith.constant 0 : index
    %c0_27 = arith.constant 0 : index
    %41 = vector.load %arg8[%c0_25, %c0_26, %c0_27] : memref<1x1x128xf32, #tpu.memory_space<vmem>>, vector<1x1x128xf32>
    tpu.vector_store %arg8[%c0_25, %c0_26, %c0_27], %40 {strides = array<i32>} : memref<1x1x128xf32, #tpu.memory_space<vmem>>, vector<1x1x128xf32>,
    return
  }
  func.func @transform_0(%arg0: i32) -> (i32, i32) {
    %c0_i32 = arith.constant 0 : i32
    %c0_i32_0 = arith.constant 0 : i32
    return %arg0, %c0_i32 : i32, i32
  }
  func.func @transform_1(%arg0: i32) -> (i32, i32) {
    %c0_i32 = arith.constant 0 : i32
    %c0_i32_0 = arith.constant 0 : i32
    %c0_i32_1 = arith.constant 0 : i32
    return %c0_i32, %c0_i32_0 : i32, i32
  }
  func.func @transform_2(%arg0: i32) -> (i32, i32) {
    %c0_i32 = arith.constant 0 : i32
    %c0_i32_0 = arith.constant 0 : i32
    %c0_i32_1 = arith.constant 0 : i32
    return %c0_i32, %c0_i32_0 : i32, i32
  }
  func.func @transform_3(%arg0: i32) -> (i32, i32) {
    %c0_i32 = arith.constant 0 : i32
    %c0_i32_0 = arith.constant 0 : i32
    %c0_i32_1 = arith.constant 0 : i32
    return %c0_i32, %c0_i32_0 : i32, i32
  }
  func.func @transform_4(%arg0: i32) -> (i32, i32) {
    %c0_i32 = arith.constant 0 : i32
    %c0_i32_0 = arith.constant 0 : i32
    %c0_i32_1 = arith.constant 0 : i32
    return %c0_i32, %c0_i32_0 : i32, i32
  }
  func.func @transform_5(%arg0: i32) -> (i32, i32) {
    %c0_i32 = arith.constant 0 : i32
    %c0_i32_0 = arith.constant 0 : i32
    %c0_i32_1 = arith.constant 0 : i32
    return %c0_i32, %c0_i32_0 : i32, i32
  }
  func.func @transform_6(%arg0: i32) -> (i32, i32) {
    %c0_i32 = arith.constant 0 : i32
    %c0_i32_0 = arith.constant 0 : i32
    %c0_i32_1 = arith.constant 0 : i32
    return %c0_i32, %c0_i32_0 : i32, i32
  }
  func.func @transform_7(%arg0: i32) -> (i32, i32, i32) {
    %c0_i32 = arith.constant 0 : i32
    %c0_i32_0 = arith.constant 0 : i32
    %c0_i32_1 = arith.constant 0 : i32
    return %arg0, %c0_i32, %c0_i32_0 : i32, i32, i32
  }
}

</mosaic_0001>

<bundles_post_ra>
// kernel: dnn_news_forward.1
= control target key start
LH: loop header
LB: loop body
LE: loop exit
PB: predicated region body
PF: predicated region fallthrough
CT: control target
= control target key end

     0   :  { %12 = vsyncpa [#allocation3], 0  ;;  %s1827_s0 = inlined_call_operand.vmem [shape: bf16[128,32], index: 0, kind: input, shape index: {}]   ;;  %s1828_s1 = inlined_call_operand.hbm [shape: bf16[32,256], index: 1, kind: input, shape index: {}]   ;;  %s1829_s2 = inlined_call_operand.hbm [shape: bf16[256,128], index: 2, kind: input, shape index: {}]   ;;  %s1830_s3 = inlined_call_operand.vmem [shape: bf16[128,128], index: 3, kind: input, shape index: {}]   ;;  %s1831_s4 = inlined_call_operand.hbm [shape: bf16[128,128], index: 4, kind: input, shape index: {}]   ;;  %s1832_s5 = inlined_call_operand.hbm [shape: bf16[128,128], index: 5, kind: input, shape index: {}]   ;;  %s1833_s6 = inlined_call_operand.vmem [shape: f32[1,768], index: 6, kind: input, shape index: {}]   ;;  %s1834_s7 = inlined_call_operand.vmem [shape: f32[1,1,128], index: 7, kind: output, shape index: {}]  }
   0x1   :  { %13 = vsyncpa [#allocation5], 0 }
   0x2   :  { %14 = vsyncpa [#allocation8], 0  ;;  %s1629_s24 = smov [#allocation4]  }
   0x3   :  { %s34_s25 = sshll.u32 %s1629_s24, 4  ;;  %s35_s25 = int_to_ptr.vmem [resolvable:$true] %s34_s25 }
   0x4   :  { %s1551_s26 = scalar_lea.vmem %s35_s25, 2048  ;;  %p1556_p1 = scmp.lt.s32.totalorder %s35_s25, %s35_s25 }
   0x5   :  { %p1552_p0 = scmp.ne.s32.totalorder %s35_s25, %s1551_s26  ;;  %p1557_p2 = scmp.lt.s32.totalorder %s1551_s26, %s1551_s26 }
   0x7   :  { %p1558_p3 = por %p1557_p2, %p1556_p1 }
   0x9   :  { %p1559_p4 = pnand %p1558_p3, %p1552_p0 }
   0xb   :  { %1562 = shalt.err (!%p1559_p4)
}
   0xc   :  { %s1630_s27 = smov 64   ;;  %s1631_s28 = smov 4  }
   0xd   :  { %40 = dma.hbm_to_vmem [thread:$0]  %s1829_s2, 2048, %s35_s25, [#allocation5], %s1630_s27, %s1630_s27, %s1631_s28  }
   0xe   :  { %s1632_s8 = smov [#allocation2]  }
   0xf   :  { %s22_s9 = sshll.u32 %s1632_s8, 4  ;;  %s23_s9 = int_to_ptr.vmem [resolvable:$true] %s22_s9 }
  0x10   :  { %s1571_s10 = scalar_lea.vmem %s23_s9, 512  ;;  %p1576_p6 = scmp.lt.s32.totalorder %s23_s9, %s23_s9 }
  0x11   :  { %p1572_p5 = scmp.ne.s32.totalorder %s23_s9, %s1571_s10  ;;  %p1577_p7 = scmp.lt.s32.totalorder %s1571_s10, %s1571_s10 }
  0x13   :  { %p1578_p8 = por %p1577_p7, %p1576_p6 }
  0x15   :  { %p1579_p9 = pnand %p1578_p8, %p1572_p5 }
  0x17   :  { %1582 = shalt.err (!%p1579_p9)
}
  0x18   :  { %s1633_s11 = smov 128   ;;  %s1634_s12 = smov 8  }
  0x19   :  { %28 = dma.hbm_to_vmem [thread:$0]  %s1828_s1, 512, %s23_s9, [#allocation3], %s1633_s11, %s1633_s11, %s1634_s12  }
  0x1a   :  { %s1635_s15 = smov [#allocation6]   ;;  %s1636_s17 = smov [#allocation7]  }
  0x1b   :  { %s48_s16 = sshll.u32 %s1635_s15, 4  ;;  %s60_s2 = sshll.u32 %s1636_s17, 4  ;;  %s49_s16 = int_to_ptr.vmem [resolvable:$true] %s48_s16  ;;  %s61_s2 = int_to_ptr.vmem [resolvable:$true] %s60_s2 }
  0x1c   :  { %s1591_s18 = scalar_lea.vmem %s49_s16, 1024  ;;  %p1596_p11 = scmp.lt.s32.totalorder %s49_s16, %s49_s16 }
  0x1d   :  { %p1592_p10 = scmp.ne.s32.totalorder %s49_s16, %s1591_s18  ;;  %p1597_p12 = scmp.lt.s32.totalorder %s1591_s18, %s1591_s18 }
  0x1f   :  { %p1598_p13 = por %p1597_p12, %p1596_p11 }
  0x21   :  { %p1599_p0 = pnand %p1598_p13, %p1592_p10 }
  0x23   :  { %1602 = shalt.err (!%p1599_p0)
}
  0x24   :  { %54 = dma.hbm_to_vmem [thread:$0]  %s1831_s4, 1024, %s49_s16, [#allocation5], %s1630_s27, %s1630_s27, %s1631_s28  }
  0x25   :  { %s1611_s1 = scalar_lea.vmem %s61_s2, 1024  ;;  %p1616_p2 = scmp.lt.s32.totalorder %s61_s2, %s61_s2 }
  0x26   :  { %p1612_p1 = scmp.ne.s32.totalorder %s61_s2, %s1611_s1  ;;  %p1617_p3 = scmp.lt.s32.totalorder %s1611_s1, %s1611_s1 }
  0x28   :  { %p1618_p4 = por %p1617_p3, %p1616_p2 }
  0x2a   :  { %p1619_p5 = pnand %p1618_p4, %p1612_p1 }
  0x2c   :  { %1622 = shalt.err (!%p1619_p5)
}
  0x2d   :  { %66 = dma.hbm_to_vmem [thread:$0]  %s1832_s5, 1024, %s61_s2, [#allocation8], %s1630_s27, %s1630_s27, %s1631_s28  }
  0x2e   :  { %1623 = dma.done.wait [#allocation3], 512  }
  0x2f   :  { %1624 = vsyncadd [#allocation3], 4294966784 }
  0x30   :  { %1625 = dma.done.wait [#allocation5], 3072  }
  0x31   :  { %1626 = vsyncadd [#allocation5], 4294964224 }
  0x32   :  { %1627 = dma.done.wait [#allocation8], 1024  }
  0x33   :  { %1628 = vsyncadd [#allocation8], 4294966272  ;;  %v1637_v0 = vmov 0   ;;  %v1489_v1 = vld [vmem:[#allocation2 + $0x14] ss:$8 sps:$4 sm:$0xff]   ;;  %v1495_v5 = vld [vmem:[%s1827_s0] sm:$0xff]   ;;  %v104_v35 = vlaneseq }
  0x34   :  { %231 = vmatprep.mubr.bf16.mxu0 %v1637_v0  ;;  %v1491_v2 = vld [vmem:[#allocation2 + $0x10] ss:$8 sps:$4 sm:$0xff]   ;;  %211 = vmatprep.subr.bf16.mxu0 %v1489_v1  ;;  %v1492_v3 = vld [vmem:[#allocation2 + $0x4] ss:$8 sps:$4 sm:$0xff]   ;;  %v1494_v4 = vld [vmem:[#allocation2] ss:$8 sps:$4 sm:$0xff]  }
  0x35   :  { %212 = vmatpush1.bf16.msra.mxu0 %v1491_v2  ;;  %vm174_vm0 = vcmask 261120   ;;  %v1503_v6 = vld [vmem:[#allocation4 + $0x78] sm:$0xff]   ;;  %v1496_v7 = vld [vmem:[%s1827_s0 + $0x8] sm:$0xff]   ;;  %v1505_v9 = vld [vmem:[#allocation4 + $0x70] sm:$0xff]   ;;  %v105_v36 = vshrl.u32 %v104_v35, 7 }
  0x36   :  { %213 = vmatprep.subr.bf16.mxu0 %v1492_v3  ;;  %v1504_v8 = vld [vmem:[#allocation4 + $0x38] sm:$0xff]   ;;  %1272 = vmatprep.subr.bf16.mxu1 %v1503_v6  ;;  %v1506_v10 = vld [vmem:[#allocation4 + $0x30] sm:$0xff]   ;;  %v1507_v11 = vld [vmem:[#allocation4 + $0x68] sm:$0xff]  }
  0x37   :  { %1273 = vmatpush3.bf16.msra.mxu1 %v1504_v8  ;;  %v1508_v12 = vld [vmem:[#allocation4 + $0x28] sm:$0xff]   ;;  %v1509_v13 = vld [vmem:[#allocation4 + $0x60] sm:$0xff]   ;;  %v1497_v14 = vld [vmem:[%s1827_s0 + $0x10] sm:$0xff]   ;;  %v110_v37 = vsub.s32 1, %v105_v36  ;;  %v106_v38 = vsub.s32 0, %v105_v36 }
  0x38   :  { %1274 = vmatprep.subr.bf16.mxu1 %v1505_v9  ;;  %v1510_v15 = vld [vmem:[#allocation4 + $0x20] sm:$0xff]   ;;  %v1511_v16 = vld [vmem:[#allocation4 + $0x58] sm:$0xff]   ;;  %v1500_v20 = vld [vmem:[%s1827_s0 + $0x28] sm:$0xff]  }
  0x39   :  { %214 = vmatpush1.bf16.msra.mxu0 %v1494_v4  ;;  %v1512_v17 = vld [vmem:[#allocation4 + $0x18] sm:$0xff]   ;;  %v1499_v19 = vld [vmem:[%s1827_s0 + $0x20] sm:$0xff]   ;;  %v1501_v21 = vld [vmem:[%s1827_s0 + $0x30] sm:$0xff]  }
  0x3a   :  { %v1498_v18 = vld [vmem:[%s1827_s0 + $0x18] sm:$0xff]   ;;  %v1513_v23 = vld [vmem:[#allocation4 + $0x50] sm:$0xff]   ;;  %v1515_v25 = vld [vmem:[#allocation4 + $0x48] sm:$0xff]  }
  0x3b   :  { %1275 = vmatpush3.bf16.msra.mxu1 %v1506_v10  ;;  %v1502_v22 = vld [vmem:[%s1827_s0 + $0x38] sm:$0xff]   ;;  %v1514_v24 = vld [vmem:[#allocation4 + $0x10] sm:$0xff]   ;;  %v1516_v26 = vld [vmem:[#allocation4 + $0x8] sm:$0xff]  }
  0x3c   :  { %1220 = vmatmul.mubr.msk.bf16.vlgmr.msra.gmra.mxu0 %vm174_vm0, %v1495_v5  ;;  %1276 = vmatprep.subr.bf16.mxu1 %v1507_v11  ;;  %v1517_v27 = vld [vmem:[#allocation4 + $0x40] sm:$0xff]   ;;  %v1519_v29 = vld [vmem:[%s1830_s3 + $0x38] sm:$0xff]   ;;  %v1520_v30 = vld [vmem:[%s1830_s3 + $0x30] sm:$0xff]  }
  0x3d   :  { %241 = vmatprep.mubr.bf16.mxu0 %v1637_v0  ;;  %v1518_v28 = vld [vmem:[#allocation4] sm:$0xff]   ;;  %1384 = vmatprep.subr.bf16.mxu0 %v1519_v29  ;;  %v1521_v31 = vld [vmem:[%s1830_s3 + $0x28] sm:$0xff]   ;;  %v1523_v33 = vld [vmem:[%s1830_s3 + $0x18] sm:$0xff]  }
  0x3e   :  { %1385 = vmatpush3.bf16.msra.mxu0 %v1519_v29  ;;  %v1522_v32 = vld [vmem:[%s1830_s3 + $0x20] sm:$0xff]   ;;  %v1524_v34 = vld [vmem:[%s1830_s3 + $0x10] sm:$0xff]  }
  0x3f   :  { %1277 = vmatpush3.bf16.msra.mxu1 %v1508_v12  ;;  %1386 = vmatprep.subr.bf16.mxu0 %v1520_v30  ;;  %v102_v39 = vld [vmem:[%s1833_s6] sm:$0x3] }
  0x40   :  { %1278 = vmatprep.subr.bf16.mxu1 %v1509_v13  ;;  %v1752_v41 = vrot.slane %v102_v39, %v110_v37  ;;  %v1754_v42 = vrot.slane %v102_v39, %v106_v38 }
  0x42   :  { %1387 = vmatpush3.bf16.msra.mxu0 %v1520_v30 }
  0x43   :  { %1279 = vmatpush3.bf16.msra.mxu1 %v1510_v15  ;;  %1388 = vmatprep.subr.bf16.mxu0 %v1521_v31 }
  0x44   :  { %1221 = vmatmul.mubr.msk.bf16.gmra.mxu0 %vm174_vm0, %v1496_v7  ;;  %1280 = vmatprep.subr.bf16.mxu1 %v1511_v16 }
  0x45   :  { %251 = vmatprep.mubr.bf16.mxu0 %v1637_v0 }
  0x46   :  { %1389 = vmatpush3.bf16.msra.mxu0 %v1521_v31 }
  0x47   :  { %1281 = vmatpush3.bf16.msra.mxu1 %v1512_v17  ;;  %1390 = vmatprep.subr.bf16.mxu0 %v1522_v32 }
  0x48   :  { %1282 = vmatprep.subr.bf16.mxu1 %v1513_v23 }
  0x4a   :  { %1391 = vmatpush3.bf16.msra.mxu0 %v1522_v32 }
  0x4b   :  { %1283 = vmatpush3.bf16.msra.mxu1 %v1514_v24  ;;  %1392 = vmatprep.subr.bf16.mxu0 %v1523_v33 }
  0x4c   :  { %1222 = vmatmul.mubr.msk.bf16.gmra.mxu0 %vm174_vm0, %v1497_v14  ;;  %1284 = vmatprep.subr.bf16.mxu1 %v1515_v25 }
  0x4d   :  { %261 = vmatprep.mubr.bf16.mxu0 %v1637_v0 }
  0x4e   :  { %1393 = vmatpush3.bf16.msra.mxu0 %v1523_v33 }
  0x4f   :  { %1285 = vmatpush3.bf16.msra.mxu1 %v1516_v26  ;;  %1394 = vmatprep.subr.bf16.mxu0 %v1524_v34 }
  0x50   :  { %1286 = vmatprep.subr.bf16.mxu1 %v1517_v27 }
  0x52   :  { %1395 = vmatpush3.bf16.msra.mxu0 %v1524_v34 }
  0x53   :  { %1287 = vmatpush3.bf16.msra.mxu1 %v1518_v28 }
  0x54   :  { %1223 = vmatmul.mubr.msk.bf16.gmra.mxu0 %vm174_vm0, %v1498_v18 }
  0x55   :  { %271 = vmatprep.mubr.bf16.mxu0 %v1637_v0 }
  0x5c   :  { %1224 = vmatmul.mubr.msk.bf16.gmra.mxu0 %vm174_vm0, %v1499_v19 }
  0x5d   :  { %281 = vmatprep.mubr.bf16.mxu0 %v1637_v0 }
  0x64   :  { %1225 = vmatmul.mubr.msk.bf16.gmra.mxu0 %vm174_vm0, %v1500_v20 }
  0x65   :  { %291 = vmatprep.mubr.bf16.mxu0 %v1637_v0 }
  0x6c   :  { %1226 = vmatmul.mubr.msk.bf16.gmra.mxu0 %vm174_vm0, %v1501_v21 }
  0x6d   :  { %301 = vmatprep.mubr.bf16.mxu0 %v1637_v0 }
  0x74   :  { %1227 = vmatmul.mubr.msk.bf16.gmra.mxu0 %vm174_vm0, %v1502_v22 }
  0xfc   :  { %v233_v40 = vpop.f32.mrf.mxu0 }
  0xfd   :  { %v234_v47 = vadd.f32 %v233_v40, %v1754_v42 }
  0xfe   :  { %v235_v43 = vpop.f32.mrf.mxu0 }
  0xff   :  { %v236_v45 = vadd.f32 %v235_v43, %v1752_v41  ;;  %v312_v54 = vmax.f32 %v234_v47, 0.0 }
 0x100   :  { %v237_v44 = vpop.f32.mrf.mxu0 }
 0x101   :  { %v238_v46 = vadd.f32 %v237_v44, %v1754_v42  ;;  %v313_v52 = vmax.f32 %v236_v45, 0.0 }
 0x102   :  { %v239_v48 = vpop.f32.mrf.mxu0 }
 0x103   :  { %v240_v49 = vadd.f32 %v239_v48, %v1752_v41  ;;  %v314_v50 = vmax.f32 %v238_v46, 0.0 }
 0x104   :  { %v243_v51 = vpop.f32.mrf.mxu0 }
 0x105   :  { %v315_v53 = vmax.f32 %v240_v49, 0.0  ;;  %v344_v57 = vpack.c.bf16 %v314_v50, %v312_v54  ;;  %v244_v61 = vadd.f32 %v243_v51, %v1754_v42 }
 0x106   :  { %v245_v55 = vpop.f32.mrf.mxu0 }
 0x107   :  { %v345_v56 = vpack.c.bf16 %v315_v53, %v313_v52  ;;  %v246_v59 = vadd.f32 %v245_v55, %v1752_v41  ;;  %v316_v4 = vmax.f32 %v244_v61, 0.0 }
 0x108   :  { %v247_v58 = vpop.f32.mrf.mxu0 }
 0x109   :  { %v248_v60 = vadd.f32 %v247_v58, %v1754_v42  ;;  %527 = vmatprep.mubr.bf16.mxu1 %v345_v56  ;;  %v317_v2 = vmax.f32 %v246_v59, 0.0 }
 0x10a   :  { %v249_v62 = vpop.f32.mrf.mxu0  ;;  %528 = vmatmul.mubr.bf16.vlgmr.msra.gmra.mxu1 %v344_v57 }
 0x10b   :  { %v250_v63 = vadd.f32 %v249_v62, %v1752_v41  ;;  %v318_v0 = vmax.f32 %v248_v60, 0.0 }
 0x10c   :  { %v253_v1 = vpop.f32.mrf.mxu0 }
 0x10d   :  { %v319_v3 = vmax.f32 %v250_v63, 0.0  ;;  %v346_v7 = vpack.c.bf16 %v318_v0, %v316_v4  ;;  %v254_v11 = vadd.f32 %v253_v1, %v1754_v42 }
 0x10e   :  { %v255_v5 = vpop.f32.mrf.mxu0 }
 0x10f   :  { %v347_v6 = vpack.c.bf16 %v319_v3, %v317_v2  ;;  %v256_v9 = vadd.f32 %v255_v5, %v1752_v41  ;;  %v320_v18 = vmax.f32 %v254_v11, 0.0 }
 0x110   :  { %v257_v8 = vpop.f32.mrf.mxu0 }
 0x111   :  { %v258_v10 = vadd.f32 %v257_v8, %v1754_v42  ;;  %535 = vmatprep.mubr.bf16.mxu1 %v347_v6  ;;  %v321_v16 = vmax.f32 %v256_v9, 0.0 }
 0x112   :  { %v259_v12 = vpop.f32.mrf.mxu0  ;;  %536 = vmatmul.mubr.bf16.gmra.mxu1 %v346_v7 }
 0x113   :  { %v260_v13 = vadd.f32 %v259_v12, %v1752_v41  ;;  %v322_v14 = vmax.f32 %v258_v10, 0.0 }
 0x114   :  { %v263_v15 = vpop.f32.mrf.mxu0 }
 0x115   :  { %v323_v17 = vmax.f32 %v260_v13, 0.0  ;;  %v348_v21 = vpack.c.bf16 %v322_v14, %v320_v18  ;;  %v264_v25 = vadd.f32 %v263_v15, %v1754_v42 }
 0x116   :  { %v265_v19 = vpop.f32.mrf.mxu0 }
 0x117   :  { %v349_v20 = vpack.c.bf16 %v323_v17, %v321_v16  ;;  %v266_v23 = vadd.f32 %v265_v19, %v1752_v41  ;;  %v324_v32 = vmax.f32 %v264_v25, 0.0 }
 0x118   :  { %v267_v22 = vpop.f32.mrf.mxu0 }
 0x119   :  { %v268_v24 = vadd.f32 %v267_v22, %v1754_v42  ;;  %543 = vmatprep.mubr.bf16.mxu1 %v349_v20  ;;  %v325_v30 = vmax.f32 %v266_v23, 0.0 }
 0x11a   :  { %v269_v26 = vpop.f32.mrf.mxu0  ;;  %544 = vmatmul.mubr.bf16.gmra.mxu1 %v348_v21 }
 0x11b   :  { %v270_v27 = vadd.f32 %v269_v26, %v1752_v41  ;;  %v326_v28 = vmax.f32 %v268_v24, 0.0 }
 0x11c   :  { %v273_v29 = vpop.f32.mrf.mxu0 }
 0x11d   :  { %v327_v31 = vmax.f32 %v270_v27, 0.0  ;;  %v350_v35 = vpack.c.bf16 %v326_v28, %v324_v32  ;;  %v274_v39 = vadd.f32 %v273_v29, %v1754_v42  ;;  %v1525_v28 = vld [vmem:[%s1830_s3 + $0x8] sm:$0xff]   ;;  %v1528_v29 = vld [vmem:[#allocation6 + $0x30] sm:$0xff]   ;;  %v1531_v32 = vld [vmem:[#allocation6 + $0x18] sm:$0xff]  }
 0x11e   :  { %v275_v33 = vpop.f32.mrf.mxu0  ;;  %1396 = vmatprep.subr.bf16.mxu0 %v1525_v28 }
 0x11f   :  { %v351_v34 = vpack.c.bf16 %v327_v31, %v325_v30  ;;  %v276_v37 = vadd.f32 %v275_v33, %v1752_v41  ;;  %v328_v48 = vmax.f32 %v274_v39, 0.0  ;;  %1397 = vmatpush3.bf16.msra.mxu0 %v1525_v28  ;;  %v1529_v30 = vld [vmem:[#allocation6 + $0x28] sm:$0xff]   ;;  %v1530_v31 = vld [vmem:[#allocation6 + $0x20] sm:$0xff]   ;;  %v1532_v33 = vld [vmem:[#allocation6 + $0x10] sm:$0xff]  }
 0x120   :  { %v277_v36 = vpop.f32.mrf.mxu0 }
 0x121   :  { %v278_v38 = vadd.f32 %v277_v36, %v1754_v42  ;;  %551 = vmatprep.mubr.bf16.mxu1 %v351_v34  ;;  %v329_v46 = vmax.f32 %v276_v37, 0.0  ;;  %v1533_v34 = vld [vmem:[#allocation6 + $0x8] sm:$0xff]  }
 0x122   :  { %v279_v40 = vpop.f32.mrf.mxu0  ;;  %552 = vmatmul.mubr.bf16.gmra.mxu1 %v350_v35 }
 0x123   :  { %v280_v43 = vadd.f32 %v279_v40, %v1752_v41  ;;  %v330_v44 = vmax.f32 %v278_v38, 0.0  ;;  %v1797_v38 = vld [vmem:[%s1833_s6 + $0x2] ss:$0 sm:$0xff] }
 0x124   :  { %v283_v45 = vpop.f32.mrf.mxu0 }
 0x125   :  { %v331_v47 = vmax.f32 %v280_v43, 0.0  ;;  %v352_v51 = vpack.c.bf16 %v330_v44, %v328_v48  ;;  %v284_v55 = vadd.f32 %v283_v45, %v1754_v42 }
 0x126   :  { %v285_v49 = vpop.f32.mrf.mxu0 }
 0x127   :  { %v353_v50 = vpack.c.bf16 %v331_v47, %v329_v46  ;;  %v286_v53 = vadd.f32 %v285_v49, %v1752_v41  ;;  %v332_v62 = vmax.f32 %v284_v55, 0.0 }
 0x128   :  { %v287_v52 = vpop.f32.mrf.mxu0 }
 0x129   :  { %v288_v54 = vadd.f32 %v287_v52, %v1754_v42  ;;  %559 = vmatprep.mubr.bf16.mxu1 %v353_v50  ;;  %v333_v60 = vmax.f32 %v286_v53, 0.0 }
 0x12a   :  { %v289_v56 = vpop.f32.mrf.mxu0  ;;  %560 = vmatmul.mubr.bf16.gmra.mxu1 %v352_v51 }
 0x12b   :  { %v290_v57 = vadd.f32 %v289_v56, %v1752_v41  ;;  %v334_v58 = vmax.f32 %v288_v54, 0.0 }
 0x12c   :  { %v293_v59 = vpop.f32.mrf.mxu0 }
 0x12d   :  { %v335_v61 = vmax.f32 %v290_v57, 0.0  ;;  %v354_v1 = vpack.c.bf16 %v334_v58, %v332_v62  ;;  %v294_v5 = vadd.f32 %v293_v59, %v1754_v42 }
 0x12e   :  { %v295_v63 = vpop.f32.mrf.mxu0 }
 0x12f   :  { %v355_v0 = vpack.c.bf16 %v335_v61, %v333_v60  ;;  %v296_v3 = vadd.f32 %v295_v63, %v1752_v41  ;;  %v336_v12 = vmax.f32 %v294_v5, 0.0 }
 0x130   :  { %v297_v2 = vpop.f32.mrf.mxu0 }
 0x131   :  { %v298_v4 = vadd.f32 %v297_v2, %v1754_v42  ;;  %567 = vmatprep.mubr.bf16.mxu1 %v355_v0  ;;  %v337_v10 = vmax.f32 %v296_v3, 0.0 }
 0x132   :  { %v299_v6 = vpop.f32.mrf.mxu0  ;;  %568 = vmatmul.mubr.bf16.gmra.mxu1 %v354_v1 }
 0x133   :  { %v300_v7 = vadd.f32 %v299_v6, %v1752_v41  ;;  %v338_v8 = vmax.f32 %v298_v4, 0.0 }
 0x134   :  { %v303_v9 = vpop.f32.mrf.mxu0 }
 0x135   :  { %v339_v11 = vmax.f32 %v300_v7, 0.0  ;;  %v356_v15 = vpack.c.bf16 %v338_v8, %v336_v12  ;;  %v304_v19 = vadd.f32 %v303_v9, %v1754_v42 }
 0x136   :  { %v305_v13 = vpop.f32.mrf.mxu0 }
 0x137   :  { %v357_v14 = vpack.c.bf16 %v339_v11, %v337_v10  ;;  %v306_v17 = vadd.f32 %v305_v13, %v1752_v41  ;;  %v340_v25 = vmax.f32 %v304_v19, 0.0 }
 0x138   :  { %v307_v16 = vpop.f32.mrf.mxu0 }
 0x139   :  { %v308_v18 = vadd.f32 %v307_v16, %v1754_v42  ;;  %575 = vmatprep.mubr.bf16.mxu1 %v357_v14  ;;  %v341_v23 = vmax.f32 %v306_v17, 0.0  ;;  %v1526_v42 = vld [vmem:[%s1830_s3] sm:$0xff]  }
 0x13a   :  { %v309_v20 = vpop.f32.mrf.mxu0  ;;  %576 = vmatmul.mubr.bf16.gmra.mxu1 %v356_v15  ;;  %1398 = vmatprep.subr.bf16.mxu0 %v1526_v42 }
 0x13b   :  { %v310_v21 = vadd.f32 %v309_v20, %v1752_v41  ;;  %v342_v22 = vmax.f32 %v308_v18, 0.0  ;;  %1399 = vmatpush3.bf16.msra.mxu0 %v1526_v42  ;;  %v1527_v41 = vld [vmem:[#allocation6 + $0x38] sm:$0xff]  }
 0x13c   :  { %1416 = vmatprep.subr.bf16.mxu1 %v1527_v41 }
 0x13d   :  { %v343_v24 = vmax.f32 %v310_v21, 0.0  ;;  %v358_v27 = vpack.c.bf16 %v342_v22, %v340_v25  ;;  %1417 = vmatpush3.bf16.msra.mxu1 %v1527_v41 }
 0x13e   :  { %1418 = vmatprep.subr.bf16.mxu1 %v1528_v29 }
 0x13f   :  { %v359_v26 = vpack.c.bf16 %v343_v24, %v341_v23 }
 0x141   :  { %583 = vmatprep.mubr.bf16.mxu1 %v359_v26  ;;  %1419 = vmatpush3.bf16.msra.mxu1 %v1528_v29 }
 0x142   :  { %584 = vmatmul.mubr.bf16.gmra.mxu1 %v358_v27  ;;  %1420 = vmatprep.subr.bf16.mxu1 %v1529_v30 }
 0x145   :  { %1421 = vmatpush3.bf16.msra.mxu1 %v1529_v30 }
 0x146   :  { %1422 = vmatprep.subr.bf16.mxu1 %v1530_v31 }
 0x149   :  { %1423 = vmatpush3.bf16.msra.mxu1 %v1530_v31 }
 0x14a   :  { %1424 = vmatprep.subr.bf16.mxu1 %v1531_v32 }
 0x14d   :  { %1425 = vmatpush3.bf16.msra.mxu1 %v1531_v32 }
 0x14e   :  { %1426 = vmatprep.subr.bf16.mxu1 %v1532_v33 }
 0x151   :  { %1427 = vmatpush3.bf16.msra.mxu1 %v1532_v33 }
 0x152   :  { %1428 = vmatprep.subr.bf16.mxu1 %v1533_v34 }
 0x155   :  { %1429 = vmatpush3.bf16.msra.mxu1 %v1533_v34 }
 0x1ca   :  { %v1288_v35 = vpop.f32.mrf.mxu1 }
 0x1cc   :  { %v1289_v36 = vpop.f32.mrf.mxu1 }
 0x1cd   :  { %v1290_v37 = vadd.f32 %v1289_v36, %v1288_v35 }
 0x1ce   :  { %v1291_v39 = vpop.f32.mrf.mxu1 }
 0x1cf   :  { %v530_v43 = vadd.f32 %v1290_v37, %v1797_v38 }
 0x1d0   :  { %v1292_v40 = vpop.f32.mrf.mxu1 }
 0x1d1   :  { %v1293_v44 = vadd.f32 %v1292_v40, %v1291_v39  ;;  %v592_v48 = vmax.f32 %v530_v43, 0.0 }
 0x1d2   :  { %v1294_v45 = vpop.f32.mrf.mxu1 }
 0x1d3   :  { %v533_v46 = vadd.f32 %v1293_v44, %v1797_v38 }
 0x1d4   :  { %v1295_v47 = vpop.f32.mrf.mxu1 }
 0x1d5   :  { %v593_v49 = vmax.f32 %v533_v46, 0.0  ;;  %v1296_v50 = vadd.f32 %v1295_v47, %v1294_v45 }
 0x1d6   :  { %v1297_v51 = vpop.f32.mrf.mxu1 }
 0x1d7   :  { %v608_v52 = vpack.c.bf16 %v593_v49, %v592_v48  ;;  %v538_v54 = vadd.f32 %v1296_v50, %v1797_v38 }
 0x1d8   :  { %v1298_v53 = vpop.f32.mrf.mxu1 }
 0x1d9   :  { %v1299_v55 = vadd.f32 %v1298_v53, %v1297_v51  ;;  %1400 = vmatprep.mubr.bf16.mxu0 %v608_v52  ;;  %v594_v59 = vmax.f32 %v538_v54, 0.0 }
 0x1da   :  { %v1300_v56 = vpop.f32.mrf.mxu1 }
 0x1db   :  { %v541_v57 = vadd.f32 %v1299_v55, %v1797_v38 }
 0x1dc   :  { %v1301_v58 = vpop.f32.mrf.mxu1 }
 0x1dd   :  { %v595_v60 = vmax.f32 %v541_v57, 0.0  ;;  %v1302_v61 = vadd.f32 %v1301_v58, %v1300_v56 }
 0x1de   :  { %v1303_v62 = vpop.f32.mrf.mxu1 }
 0x1df   :  { %v609_v63 = vpack.c.bf16 %v595_v60, %v594_v59  ;;  %v546_v1 = vadd.f32 %v1302_v61, %v1797_v38 }
 0x1e0   :  { %v1304_v0 = vpop.f32.mrf.mxu1 }
 0x1e1   :  { %v1305_v2 = vadd.f32 %v1304_v0, %v1303_v62  ;;  %1401 = vmatmul.mubr.bf16.vlgmr.msra.gmra.mxu0 %v609_v63  ;;  %v596_v6 = vmax.f32 %v546_v1, 0.0  ;;  %v1534_v63 = vld [vmem:[#allocation6] sm:$0xff]   ;;  %v1535_v0 = vld [vmem:[#allocation7 + $0x38] sm:$0xff]   ;;  %v1536_v1 = vld [vmem:[#allocation7 + $0x30] sm:$0xff]  }
 0x1e2   :  { %v1306_v3 = vpop.f32.mrf.mxu1  ;;  %1430 = vmatprep.subr.bf16.mxu1 %v1534_v63  ;;  %1448 = vmatprep.subr.bf16.mxu0 %v1535_v0 }
 0x1e3   :  { %v549_v4 = vadd.f32 %v1305_v2, %v1797_v38  ;;  %1431 = vmatpush3.bf16.msra.mxu1 %v1534_v63  ;;  %1449 = vmatpush3.bf16.msra.mxu0 %v1535_v0  ;;  %v1537_v2 = vld [vmem:[#allocation7 + $0x28] sm:$0xff]   ;;  %v1542_v0 = vld [vmem:[#allocation7] sm:$0xff]  }
 0x1e4   :  { %v1307_v5 = vpop.f32.mrf.mxu1  ;;  %1450 = vmatprep.subr.bf16.mxu0 %v1536_v1  ;;  %v1541_v63 = vld [vmem:[#allocation7 + $0x8] sm:$0xff]  }
 0x1e5   :  { %v597_v7 = vmax.f32 %v549_v4, 0.0  ;;  %v1308_v8 = vadd.f32 %v1307_v5, %v1306_v3  ;;  %v1538_v3 = vld [vmem:[#allocation7 + $0x20] sm:$0xff]   ;;  %v1539_v4 = vld [vmem:[#allocation7 + $0x18] sm:$0xff]  }
 0x1e6   :  { %v1309_v9 = vpop.f32.mrf.mxu1 }
 0x1e7   :  { %v610_v10 = vpack.c.bf16 %v597_v7, %v596_v6  ;;  %v554_v12 = vadd.f32 %v1308_v8, %v1797_v38  ;;  %1451 = vmatpush3.bf16.msra.mxu0 %v1536_v1  ;;  %v1245_v6 = vld [vmem:[%s1833_s6 + $0x3] ss:$0 sm:$0xff] }
 0x1e8   :  { %v1310_v11 = vpop.f32.mrf.mxu1  ;;  %1452 = vmatprep.subr.bf16.mxu0 %v1537_v2 }
 0x1e9   :  { %v1311_v13 = vadd.f32 %v1310_v11, %v1309_v9  ;;  %1404 = vmatprep.mubr.bf16.mxu0 %v610_v10  ;;  %v598_v17 = vmax.f32 %v554_v12, 0.0 }
 0x1ea   :  { %v1312_v14 = vpop.f32.mrf.mxu1 }
 0x1eb   :  { %v557_v15 = vadd.f32 %v1311_v13, %v1797_v38  ;;  %1453 = vmatpush3.bf16.msra.mxu0 %v1537_v2 }
 0x1ec   :  { %v1313_v16 = vpop.f32.mrf.mxu1  ;;  %1454 = vmatprep.subr.bf16.mxu0 %v1538_v3 }
 0x1ed   :  { %v599_v18 = vmax.f32 %v557_v15, 0.0  ;;  %v1314_v19 = vadd.f32 %v1313_v16, %v1312_v14 }
 0x1ee   :  { %v1315_v20 = vpop.f32.mrf.mxu1 }
 0x1ef   :  { %v611_v21 = vpack.c.bf16 %v599_v18, %v598_v17  ;;  %v562_v23 = vadd.f32 %v1314_v19, %v1797_v38  ;;  %1455 = vmatpush3.bf16.msra.mxu0 %v1538_v3  ;;  %v1254_v3 = vld [vmem:[%s1833_s6 + $0x4] ss:$0 sm:$0xff] }
 0x1f0   :  { %v1316_v22 = vpop.f32.mrf.mxu1  ;;  %1456 = vmatprep.subr.bf16.mxu0 %v1539_v4 }
 0x1f1   :  { %v1317_v24 = vadd.f32 %v1316_v22, %v1315_v20  ;;  %1405 = vmatmul.mubr.bf16.gmra.mxu0 %v611_v21  ;;  %v600_v28 = vmax.f32 %v562_v23, 0.0 }
 0x1f2   :  { %v1318_v25 = vpop.f32.mrf.mxu1 }
 0x1f3   :  { %v565_v26 = vadd.f32 %v1317_v24, %v1797_v38  ;;  %1457 = vmatpush3.bf16.msra.mxu0 %v1539_v4 }
 0x1f4   :  { %v1319_v27 = vpop.f32.mrf.mxu1 }
 0x1f5   :  { %v601_v42 = vmax.f32 %v565_v26, 0.0  ;;  %v1320_v41 = vadd.f32 %v1319_v27, %v1318_v25 }
 0x1f6   :  { %v1321_v29 = vpop.f32.mrf.mxu1 }
 0x1f7   :  { %v612_v30 = vpack.c.bf16 %v601_v42, %v600_v28  ;;  %v570_v32 = vadd.f32 %v1320_v41, %v1797_v38 }
 0x1f8   :  { %v1322_v31 = vpop.f32.mrf.mxu1 }
 0x1f9   :  { %v1323_v33 = vadd.f32 %v1322_v31, %v1321_v29  ;;  %1408 = vmatprep.mubr.bf16.mxu0 %v612_v30  ;;  %v602_v37 = vmax.f32 %v570_v32, 0.0 }
 0x1fa   :  { %v1324_v34 = vpop.f32.mrf.mxu1 }
 0x1fb   :  { %v573_v35 = vadd.f32 %v1323_v33, %v1797_v38 }
 0x1fc   :  { %v1325_v36 = vpop.f32.mrf.mxu1 }
 0x1fd   :  { %v603_v39 = vmax.f32 %v573_v35, 0.0  ;;  %v1326_v40 = vadd.f32 %v1325_v36, %v1324_v34 }
 0x1fe   :  { %v1327_v43 = vpop.f32.mrf.mxu1 }
 0x1ff   :  { %v613_v44 = vpack.c.bf16 %v603_v39, %v602_v37  ;;  %v578_v46 = vadd.f32 %v1326_v40, %v1797_v38 }
 0x200   :  { %v1328_v45 = vpop.f32.mrf.mxu1 }
 0x201   :  { %v1329_v47 = vadd.f32 %v1328_v45, %v1327_v43  ;;  %1409 = vmatmul.mubr.bf16.gmra.mxu0 %v613_v44  ;;  %v604_v51 = vmax.f32 %v578_v46, 0.0 }
 0x202   :  { %v1330_v48 = vpop.f32.mrf.mxu1 }
 0x203   :  { %v581_v49 = vadd.f32 %v1329_v47, %v1797_v38 }
 0x204   :  { %v1331_v50 = vpop.f32.mrf.mxu1 }
 0x205   :  { %v605_v52 = vmax.f32 %v581_v49, 0.0  ;;  %v1332_v53 = vadd.f32 %v1331_v50, %v1330_v48 }
 0x206   :  { %v1333_v54 = vpop.f32.mrf.mxu1 }
 0x207   :  { %v614_v55 = vpack.c.bf16 %v605_v52, %v604_v51  ;;  %v586_v57 = vadd.f32 %v1332_v53, %v1797_v38 }
 0x208   :  { %v1334_v56 = vpop.f32.mrf.mxu1 }
 0x209   :  { %v1335_v58 = vadd.f32 %v1334_v56, %v1333_v54  ;;  %1412 = vmatprep.mubr.bf16.mxu0 %v614_v55  ;;  %v606_v60 = vmax.f32 %v586_v57, 0.0 }
 0x20b   :  { %v589_v59 = vadd.f32 %v1335_v58, %v1797_v38 }
 0x20d   :  { %v607_v61 = vmax.f32 %v589_v59, 0.0 }
 0x20f   :  { %v615_v62 = vpack.c.bf16 %v607_v61, %v606_v60 }
 0x211   :  { %1413 = vmatmul.mubr.bf16.gmra.mxu0 %v615_v62  ;;  %v1540_v62 = vld [vmem:[#allocation7 + $0x10] sm:$0xff]  }
 0x212   :  { %1458 = vmatprep.subr.bf16.mxu0 %v1540_v62 }
 0x213   :  { %1459 = vmatpush3.bf16.msra.mxu0 %v1540_v62 }
 0x214   :  { %1460 = vmatprep.subr.bf16.mxu0 %v1541_v63 }
 0x217   :  { %1461 = vmatpush3.bf16.msra.mxu0 %v1541_v63 }
 0x218   :  { %1462 = vmatprep.subr.bf16.mxu0 %v1542_v0 }
 0x21b   :  { %1463 = vmatpush3.bf16.msra.mxu0 %v1542_v0 }
 0x2a1   :  { %v1402_v38 = vpop.f32.mrf.mxu0 }
 0x2a2   :  { %v730_v10 = vadd.f32 %v1402_v38, %v1245_v6 }
 0x2a3   :  { %v721_v5 = vpop.f32.mrf.mxu0 }
 0x2a4   :  { %v722_v8 = vadd.f32 %v1245_v6, %v721_v5  ;;  %v786_v16 = vmax.f32 %v730_v10, 0.0 }
 0x2a5   :  { %v1403_v7 = vpop.f32.mrf.mxu0 }
 0x2a6   :  { %v733_v9 = vadd.f32 %v1403_v7, %v1245_v6  ;;  %v784_v14 = vmax.f32 %v722_v8, 0.0 }
 0x2a7   :  { %v724_v11 = vpop.f32.mrf.mxu0 }
 0x2a8   :  { %v725_v12 = vadd.f32 %v1245_v6, %v724_v11  ;;  %v787_v13 = vmax.f32 %v733_v9, 0.0 }
 0x2aa   :  { %v785_v15 = vmax.f32 %v725_v12, 0.0  ;;  %v801_v18 = vpack.c.bf16 %v787_v13, %v786_v16 }
 0x2ac   :  { %v800_v17 = vpack.c.bf16 %v785_v15, %v784_v14 }
 0x2ae   :  { %1432 = vmatprep.mubr.bf16.mxu1 %v800_v17 }
 0x2af   :  { %1433 = vmatmul.mubr.bf16.vlgmr.msra.gmra.mxu1 %v801_v18 }
 0x2b1   :  { %v1406_v19 = vpop.f32.mrf.mxu0 }
 0x2b2   :  { %v746_v24 = vadd.f32 %v1406_v19, %v1245_v6 }
 0x2b3   :  { %v737_v20 = vpop.f32.mrf.mxu0 }
 0x2b4   :  { %v738_v22 = vadd.f32 %v1245_v6, %v737_v20  ;;  %v790_v41 = vmax.f32 %v746_v24, 0.0 }
 0x2b5   :  { %v1407_v21 = vpop.f32.mrf.mxu0 }
 0x2b6   :  { %v749_v23 = vadd.f32 %v1407_v21, %v1245_v6  ;;  %v788_v28 = vmax.f32 %v738_v22, 0.0 }
 0x2b7   :  { %v740_v25 = vpop.f32.mrf.mxu0 }
 0x2b8   :  { %v741_v26 = vadd.f32 %v1245_v6, %v740_v25  ;;  %v791_v27 = vmax.f32 %v749_v23, 0.0 }
 0x2ba   :  { %v789_v42 = vmax.f32 %v741_v26, 0.0  ;;  %v803_v30 = vpack.c.bf16 %v791_v27, %v790_v41 }
 0x2bc   :  { %v802_v29 = vpack.c.bf16 %v789_v42, %v788_v28 }
 0x2be   :  { %1436 = vmatprep.mubr.bf16.mxu1 %v802_v29 }
 0x2bf   :  { %1437 = vmatmul.mubr.bf16.gmra.mxu1 %v803_v30 }
 0x2c1   :  { %v1410_v31 = vpop.f32.mrf.mxu0 }
 0x2c2   :  { %v762_v36 = vadd.f32 %v1410_v31, %v1245_v6 }
 0x2c3   :  { %v753_v32 = vpop.f32.mrf.mxu0 }
 0x2c4   :  { %v754_v34 = vadd.f32 %v1245_v6, %v753_v32  ;;  %v794_v45 = vmax.f32 %v762_v36, 0.0 }
 0x2c5   :  { %v1411_v33 = vpop.f32.mrf.mxu0 }
 0x2c6   :  { %v765_v35 = vadd.f32 %v1411_v33, %v1245_v6  ;;  %v792_v43 = vmax.f32 %v754_v34, 0.0 }
 0x2c7   :  { %v756_v37 = vpop.f32.mrf.mxu0 }
 0x2c8   :  { %v757_v39 = vadd.f32 %v1245_v6, %v756_v37  ;;  %v795_v40 = vmax.f32 %v765_v35, 0.0 }
 0x2ca   :  { %v793_v44 = vmax.f32 %v757_v39, 0.0  ;;  %v805_v47 = vpack.c.bf16 %v795_v40, %v794_v45 }
 0x2cc   :  { %v804_v46 = vpack.c.bf16 %v793_v44, %v792_v43 }
 0x2ce   :  { %1440 = vmatprep.mubr.bf16.mxu1 %v804_v46 }
 0x2cf   :  { %1441 = vmatmul.mubr.bf16.gmra.mxu1 %v805_v47 }
 0x2d1   :  { %v1414_v48 = vpop.f32.mrf.mxu0 }
 0x2d2   :  { %v778_v53 = vadd.f32 %v1414_v48, %v1245_v6 }
 0x2d3   :  { %v769_v49 = vpop.f32.mrf.mxu0 }
 0x2d4   :  { %v770_v51 = vadd.f32 %v1245_v6, %v769_v49  ;;  %v798_v59 = vmax.f32 %v778_v53, 0.0 }
 0x2d5   :  { %v1415_v50 = vpop.f32.mrf.mxu0 }
 0x2d6   :  { %v781_v52 = vadd.f32 %v1415_v50, %v1245_v6  ;;  %v796_v57 = vmax.f32 %v770_v51, 0.0 }
 0x2d7   :  { %v772_v54 = vpop.f32.mrf.mxu0 }
 0x2d8   :  { %v773_v55 = vadd.f32 %v1245_v6, %v772_v54  ;;  %v799_v56 = vmax.f32 %v781_v52, 0.0 }
 0x2da   :  { %v797_v58 = vmax.f32 %v773_v55, 0.0  ;;  %v807_v61 = vpack.c.bf16 %v799_v56, %v798_v59  ;;  %v1263_v59 = vld [vmem:[%s1833_s6 + $0x5] ss:$0 sm:$0xff] }
 0x2dc   :  { %v806_v60 = vpack.c.bf16 %v797_v58, %v796_v57 }
 0x2de   :  { %1444 = vmatprep.mubr.bf16.mxu1 %v806_v60 }
 0x2df   :  { %1445 = vmatmul.mubr.bf16.gmra.mxu1 %v807_v61 }
 0x36f   :  { %v1434_v1 = vpop.f32.mrf.mxu1 }
 0x370   :  { %v922_v6 = vadd.f32 %v1434_v1, %v1254_v3 }
 0x371   :  { %v913_v2 = vpop.f32.mrf.mxu1 }
 0x372   :  { %v914_v38 = vadd.f32 %v1254_v3, %v913_v2  ;;  %v978_v12 = vmax.f32 %v922_v6, 0.0 }
 0x373   :  { %v1435_v4 = vpop.f32.mrf.mxu1 }
 0x374   :  { %v925_v5 = vadd.f32 %v1435_v4, %v1254_v3  ;;  %v976_v10 = vmax.f32 %v914_v38, 0.0 }
 0x375   :  { %v916_v7 = vpop.f32.mrf.mxu1 }
 0x376   :  { %v917_v8 = vadd.f32 %v1254_v3, %v916_v7  ;;  %v979_v9 = vmax.f32 %v925_v5, 0.0 }
 0x378   :  { %v977_v11 = vmax.f32 %v917_v8, 0.0  ;;  %v993_v14 = vpack.c.bf16 %v979_v9, %v978_v12 }
 0x37a   :  { %v992_v13 = vpack.c.bf16 %v977_v11, %v976_v10 }
 0x37c   :  { %1464 = vmatprep.mubr.bf16.mxu0 %v992_v13 }
 0x37d   :  { %1465 = vmatmul.mubr.bf16.vlgmr.msra.gmra.mxu0 %v993_v14 }
 0x37f   :  { %v1438_v15 = vpop.f32.mrf.mxu1 }
 0x380   :  { %v938_v20 = vadd.f32 %v1438_v15, %v1254_v3 }
 0x381   :  { %v929_v16 = vpop.f32.mrf.mxu1 }
 0x382   :  { %v930_v18 = vadd.f32 %v1254_v3, %v929_v16  ;;  %v982_v26 = vmax.f32 %v938_v20, 0.0 }
 0x383   :  { %v1439_v17 = vpop.f32.mrf.mxu1 }
 0x384   :  { %v941_v19 = vadd.f32 %v1439_v17, %v1254_v3  ;;  %v980_v24 = vmax.f32 %v930_v18, 0.0 }
 0x385   :  { %v932_v21 = vpop.f32.mrf.mxu1 }
 0x386   :  { %v933_v22 = vadd.f32 %v1254_v3, %v932_v21  ;;  %v983_v23 = vmax.f32 %v941_v19, 0.0 }
 0x388   :  { %v981_v25 = vmax.f32 %v933_v22, 0.0  ;;  %v995_v28 = vpack.c.bf16 %v983_v23, %v982_v26 }
 0x38a   :  { %v994_v27 = vpack.c.bf16 %v981_v25, %v980_v24 }
 0x38c   :  { %1468 = vmatprep.mubr.bf16.mxu0 %v994_v27 }
 0x38d   :  { %1469 = vmatmul.mubr.bf16.gmra.mxu0 %v995_v28 }
 0x38f   :  { %v1442_v42 = vpop.f32.mrf.mxu1 }
 0x390   :  { %v954_v32 = vadd.f32 %v1442_v42, %v1254_v3 }
 0x391   :  { %v945_v41 = vpop.f32.mrf.mxu1 }
 0x392   :  { %v946_v30 = vadd.f32 %v1254_v3, %v945_v41  ;;  %v986_v39 = vmax.f32 %v954_v32, 0.0 }
 0x393   :  { %v1443_v29 = vpop.f32.mrf.mxu1 }
 0x394   :  { %v957_v31 = vadd.f32 %v1443_v29, %v1254_v3  ;;  %v984_v36 = vmax.f32 %v946_v30, 0.0 }
 0x395   :  { %v948_v33 = vpop.f32.mrf.mxu1 }
 0x396   :  { %v949_v34 = vadd.f32 %v1254_v3, %v948_v33  ;;  %v987_v35 = vmax.f32 %v957_v31, 0.0 }
 0x398   :  { %v985_v37 = vmax.f32 %v949_v34, 0.0  ;;  %v997_v43 = vpack.c.bf16 %v987_v35, %v986_v39 }
 0x39a   :  { %v996_v40 = vpack.c.bf16 %v985_v37, %v984_v36 }
 0x39c   :  { %1472 = vmatprep.mubr.bf16.mxu0 %v996_v40 }
 0x39d   :  { %1473 = vmatmul.mubr.bf16.gmra.mxu0 %v997_v43 }
 0x39f   :  { %v1446_v44 = vpop.f32.mrf.mxu1 }
 0x3a0   :  { %v970_v49 = vadd.f32 %v1446_v44, %v1254_v3 }
 0x3a1   :  { %v961_v45 = vpop.f32.mrf.mxu1 }
 0x3a2   :  { %v962_v47 = vadd.f32 %v1254_v3, %v961_v45  ;;  %v990_v55 = vmax.f32 %v970_v49, 0.0 }
 0x3a3   :  { %v1447_v46 = vpop.f32.mrf.mxu1 }
 0x3a4   :  { %v973_v48 = vadd.f32 %v1447_v46, %v1254_v3  ;;  %v988_v53 = vmax.f32 %v962_v47, 0.0 }
 0x3a5   :  { %v964_v50 = vpop.f32.mrf.mxu1 }
 0x3a6   :  { %v965_v51 = vadd.f32 %v1254_v3, %v964_v50  ;;  %v991_v52 = vmax.f32 %v973_v48, 0.0 }
 0x3a8   :  { %v989_v54 = vmax.f32 %v965_v51, 0.0  ;;  %v999_v57 = vpack.c.bf16 %v991_v52, %v990_v55 }
 0x3aa   :  { %v998_v56 = vpack.c.bf16 %v989_v54, %v988_v53 }
 0x3ac   :  { %1476 = vmatprep.mubr.bf16.mxu0 %v998_v56 }
 0x3ad   :  { %1477 = vmatmul.mubr.bf16.gmra.mxu0 %v999_v57 }
 0x43d   :  { %v1466_v58 = vpop.f32.mrf.mxu0 }
 0x43e   :  { %v1114_v1 = vadd.f32 %v1466_v58, %v1263_v59 }
 0x43f   :  { %v1105_v60 = vpop.f32.mrf.mxu0 }
 0x440   :  { %v1106_v61 = vadd.f32 %v1263_v59, %v1105_v60 }
 0x441   :  { %v1467_v62 = vpop.f32.mrf.mxu0 }
 0x442   :  { %1168 = vxpose.xlu0.b32.start [1/16] (narrow) %v1106_v61, 8  ;;  %v1117_v2 = vadd.f32 %v1467_v62, %v1263_v59 }
 0x443   :  { %v1108_v63 = vpop.f32.mrf.mxu0 }
 0x444   :  { %v1109_v0 = vadd.f32 %v1263_v59, %v1108_v63 }
 0x446   :  { %1169 = vxpose.xlu0.b32.cont [2/16] (narrow) %v1109_v0, 8 }
 0x44a   :  { %1170 = vxpose.xlu0.b32.cont [3/16] (narrow) %v1114_v1, 8 }
 0x44d   :  { %v1470_v3 = vpop.f32.mrf.mxu0 }
 0x44e   :  { %1171 = vxpose.xlu0.b32.cont [4/16] (narrow) %v1117_v2, 8  ;;  %v1130_v8 = vadd.f32 %v1470_v3, %v1263_v59 }
 0x44f   :  { %v1121_v4 = vpop.f32.mrf.mxu0 }
 0x450   :  { %v1122_v38 = vadd.f32 %v1263_v59, %v1121_v4 }
 0x451   :  { %v1471_v5 = vpop.f32.mrf.mxu0 }
 0x452   :  { %1172 = vxpose.xlu0.b32.cont [5/16] (narrow) %v1122_v38, 8  ;;  %v1133_v9 = vadd.f32 %v1471_v5, %v1263_v59 }
 0x453   :  { %v1124_v6 = vpop.f32.mrf.mxu0 }
 0x454   :  { %v1125_v7 = vadd.f32 %v1263_v59, %v1124_v6 }
 0x456   :  { %1173 = vxpose.xlu0.b32.cont [6/16] (narrow) %v1125_v7, 8 }
 0x45a   :  { %1174 = vxpose.xlu0.b32.cont [7/16] (narrow) %v1130_v8, 8 }
 0x45d   :  { %v1474_v10 = vpop.f32.mrf.mxu0 }
 0x45e   :  { %1175 = vxpose.xlu0.b32.cont [8/16] (narrow) %v1133_v9, 8  ;;  %v1146_v16 = vadd.f32 %v1474_v10, %v1263_v59 }
 0x45f   :  { %v1137_v11 = vpop.f32.mrf.mxu0 }
 0x460   :  { %v1138_v12 = vadd.f32 %v1263_v59, %v1137_v11 }
 0x461   :  { %v1475_v13 = vpop.f32.mrf.mxu0 }
 0x462   :  { %1176 = vxpose.xlu0.b32.cont [9/16] (narrow) %v1138_v12, 8  ;;  %v1149_v17 = vadd.f32 %v1475_v13, %v1263_v59 }
 0x463   :  { %v1140_v14 = vpop.f32.mrf.mxu0 }
 0x464   :  { %v1141_v15 = vadd.f32 %v1263_v59, %v1140_v14 }
 0x466   :  { %1177 = vxpose.xlu0.b32.cont [10/16] (narrow) %v1141_v15, 8 }
 0x46a   :  { %1178 = vxpose.xlu0.b32.cont [11/16] (narrow) %v1146_v16, 8 }
 0x46d   :  { %v1478_v18 = vpop.f32.mrf.mxu0 }
 0x46e   :  { %1179 = vxpose.xlu0.b32.cont [12/16] (narrow) %v1149_v17, 8  ;;  %v1162_v24 = vadd.f32 %v1478_v18, %v1263_v59 }
 0x46f   :  { %v1153_v19 = vpop.f32.mrf.mxu0 }
 0x470   :  { %v1154_v20 = vadd.f32 %v1263_v59, %v1153_v19 }
 0x471   :  { %v1479_v21 = vpop.f32.mrf.mxu0 }
 0x472   :  { %1180 = vxpose.xlu0.b32.cont [13/16] (narrow) %v1154_v20, 8  ;;  %v1165_v25 = vadd.f32 %v1479_v21, %v1263_v59 }
 0x473   :  { %v1156_v22 = vpop.f32.mrf.mxu0 }
 0x474   :  { %v1157_v23 = vadd.f32 %v1263_v59, %v1156_v22 }
 0x476   :  { %1181 = vxpose.xlu0.b32.cont [14/16] (narrow) %v1157_v23, 8 }
 0x47a   :  { %1182 = vxpose.xlu0.b32.cont [15/16] (narrow) %v1162_v24, 8 }
 0x47e   :  { %1183 = vxpose.xlu0.b32.end [16/16] (narrow) %v1165_v25, 8 }
 0x4be   :  { %v1184_v26 = vpop.trf.xlu0 }
 0x4bf   :  { %1200 = vst [vmem:[%s1834_s7] sm:$0x1] %v1184_v26 }
 0x4c0   :  { %1205 = vsyncpa [#allocation3], 1 }
 0x4c1   :  { %1206 = vsyncpa [#allocation5], 1 }
 0x4c2   :  { %1207 = vsyncpa [#allocation8], 1 }

</bundles_post_ra>
